<compile_context>
chip_gen: v6e
topology: v6e:2x2x1
jax: 0.10.0
libtpu: 0.0.40
codegen_flags: <defaults>
</compile_context>

<pallas_src>
import numpy as np
import jax
import jax.numpy as jnp
from jax.experimental import pallas as pl
from jax.experimental.pallas import tpu as pltpu

EPS = 1e-5  # BatchNorm eps (PyTorch default)


# ----------------------------------------------------------------------------
# Pallas kernel: one batch image per grid step, everything fused.
# ----------------------------------------------------------------------------
def _psp_kernel(x_ref, wrf_ref, brf_ref, at_ref, wcat_ref, bcat_ref,
                mask_ref, ut_ref, o_ref):
    xt = x_ref[0]                                            # (Cin, HW)  bf16

    # rf branch: full-resolution 1x1 conv (BN folded into W) + bias + ReLU
    zrf = jnp.dot(wrf_ref[...], xt, preferred_element_type=jnp.float32)
    zrf = jnp.maximum(zrf + brf_ref[...], 0.0)               # (Corf, HW) f32

    # pooled branches (factored): adaptive-avg-pool -> 1x1 conv -> block mask
    # -> nearest-upsample (0/1 selection matmul).
    pooled = jnp.dot(xt, at_ref[...],
                     preferred_element_type=jnp.float32)     # (Cin, S)
    z = jnp.dot(wcat_ref[...], pooled.astype(jnp.bfloat16),
                preferred_element_type=jnp.float32)          # (K*Co, S)
    z = jnp.maximum(z + bcat_ref[...], 0.0) * mask_ref[...]  # keep own branch
    zup = jnp.dot(z.astype(jnp.bfloat16), ut_ref[...],
                  preferred_element_type=jnp.float32)        # (K*Co, HW)

    out = jnp.concatenate([zrf, zup], axis=0)                # (Cout, HW)
    o_ref[...] = out.reshape(o_ref.shape).astype(o_ref.dtype)


# ----------------------------------------------------------------------------
# Pallas wrapper
# ----------------------------------------------------------------------------
def psp_fused_pallas(xflat, wrfT, brfT, AT, WcatT, bcatT, mask, UT):
    N, Cin, HW = xflat.shape
    Corf = wrfT.shape[0]
    KCo = WcatT.shape[0]
    S = AT.shape[1]
    Cout = Corf + KCo
    return pl.pallas_call(
        _psp_kernel,
        out_shape=jax.ShapeDtypeStruct((N, Cout, HW), jnp.float32),
        grid=(N,),
        in_specs=[
            pl.BlockSpec((1, Cin, HW), lambda n: (n, 0, 0)),   # x (per batch)
            pl.BlockSpec((Corf, Cin), lambda n: (0, 0)),       # rf weight^T
            pl.BlockSpec((Corf, 1), lambda n: (0, 0)),         # rf bias
            pl.BlockSpec((HW, S), lambda n: (0, 0)),           # pool op A^T
            pl.BlockSpec((KCo, Cin), lambda n: (0, 0)),        # branch weights^T
            pl.BlockSpec((KCo, 1), lambda n: (0, 0)),          # branch biases
            pl.BlockSpec((KCo, S), lambda n: (0, 0)),          # block-diag mask
            pl.BlockSpec((S, HW), lambda n: (0, 0)),           # upsample U^T
        ],
        out_specs=pl.BlockSpec((1, Cout, HW), lambda n: (n, 0, 0)),
        compiler_params=pltpu.CompilerParams(
            dimension_semantics=("parallel",)),
    )(xflat, wrfT, brfT, AT, WcatT, bcatT, mask, UT)


# ----------------------------------------------------------------------------
# Host-side glue: pool/upsample operators, BN folding, parameter init, forward
# ----------------------------------------------------------------------------
def _adaptive_pool_1d(s, L):
    """PyTorch AdaptiveAvgPool1d(s) as an (s, L) averaging matrix."""
    A = np.zeros((s, L), np.float32)
    for j in range(s):
        a = (j * L) // s
        b = ((j + 1) * L + s - 1) // s          # ceil
        A[j, a:b] = 1.0 / (b - a)
    return A


def _nearest_select_1d(s, L):
    """Nearest-upsample s -> L as an (L, s) 0/1 selection matrix."""
    U = np.zeros((L, s), np.float32)
    for h in range(L):
        U[h, (h * s) // L] = 1.0
    return U


def build_pool_operators(sizes, H, W, n_branch_ch):
    """A^T (HW, S_pad), U^T (S_pad, HW) and a (K*Co, S_pad) block-diag mask."""
    HW = H * W
    S_total = sum(s * s for s in sizes)
    S_pad = ((S_total + 127) // 128) * 128      # lane-friendly padded S
    A = np.zeros((S_pad, HW), np.float32)
    UT = np.zeros((S_pad, HW), np.float32)
    mask = np.zeros((len(sizes) * n_branch_ch, S_pad), np.float32)
    off = 0
    for k, s in enumerate(sizes):
        A[off:off + s * s] = np.kron(_adaptive_pool_1d(s, H),
                                     _adaptive_pool_1d(s, W))
        UT[off:off + s * s] = np.kron(_nearest_select_1d(s, H),
                                      _nearest_select_1d(s, W)).T
        mask[k * n_branch_ch:(k + 1) * n_branch_ch, off:off + s * s] = 1.0
        off += s * s
    return np.ascontiguousarray(A.T), UT, mask


def _conv_bn_params(key, cin, cout):
    k1, k2, k3, k4, k5, k6 = jax.random.split(key, 6)
    return dict(
        w=jax.random.normal(k1, (cin, cout), jnp.float32) / np.sqrt(cin),
        b=0.1 * jax.random.normal(k2, (cout,), jnp.float32),
        gamma=jax.random.uniform(k3, (cout,), jnp.float32, 0.5, 1.5),
        beta=0.1 * jax.random.normal(k4, (cout,), jnp.float32),
        mean=0.1 * jax.random.normal(k5, (cout,), jnp.float32),
        var=jax.random.uniform(k6, (cout,), jnp.float32, 0.5, 1.5),
    )


def init_params(key, cin, sizes):
    keys = jax.random.split(key, 1 + len(sizes))
    params = {"rf": _conv_bn_params(keys[0], cin, cin // 2)}
    for i, s in enumerate(sizes):
        params[f"pool{s}"] = _conv_bn_params(keys[1 + i], cin, cin // 8)
    return params


def _fold_bn(p):
    """Fold eval-mode BN into the 1x1 conv: returns W'^T (Cout, Cin) and b'."""
    scale = p["gamma"] / jnp.sqrt(p["var"] + EPS)
    wT = (p["w"] * scale[None, :]).T
    b = (p["b"] - p["mean"]) * scale + p["beta"]
    return wT, b


def psp_forward_pallas(x_nchw, params, sizes):
    N, C, H, W = x_nchw.shape
    HW = H * W
    Co = C // 8                                  # keep_feats=True -> out_feats = C

    wrfT, brf = _fold_bn(params["rf"])                        # (C//2, C), (C//2,)
    ws, bs = zip(*[_fold_bn(params[f"pool{s}"]) for s in sizes])
    WcatT = jnp.concatenate(ws, axis=0)                       # (K*Co, C)
    bcat = jnp.concatenate(bs, axis=0)                        # (K*Co,)

    AT, UT, mask = build_pool_operators(sizes, H, W, Co)

    # NCHW stays NCHW: channels on sublanes, flattened spatial on lanes.
    xflat = x_nchw.reshape(N, C, HW).astype(jnp.bfloat16)

    out = psp_fused_pallas(
        xflat,
        wrfT.astype(jnp.bfloat16),
        brf.reshape(-1, 1).astype(jnp.float32),
        jnp.asarray(AT, jnp.bfloat16),
        WcatT.astype(jnp.bfloat16),
        bcat.reshape(-1, 1).astype(jnp.float32),
        jnp.asarray(mask, jnp.float32),
        jnp.asarray(UT, jnp.bfloat16),
    )                                                         # (N, Cout, HW)
    return out.reshape(N, out.shape[1], H, W)


# ----------------------------------------------------------------------------
# Pure-JAX reference mirroring the PyTorch module (for a correctness check)
# ----------------------------------------------------------------------------
def _conv1x1_ref(x, p):
    return jnp.einsum("nchw,co->nohw", x, p["w"]) + p["b"][None, :, None, None]


def _bn_relu_ref(x, p):
    y = (x - p["mean"][None, :, None, None]) / jnp.sqrt(p["var"][None, :, None, None] + EPS)
    y = y * p["gamma"][None, :, None, None] + p["beta"][None, :, None, None]
    return jnp.maximum(y, 0.0)


def _adaptive_avg_pool_ref(x, s):
    _, _, H, W = x.shape
    rows = []
    for j in range(s):
        h0, h1 = (j * H) // s, ((j + 1) * H + s - 1) // s
        cols = []
        for i in range(s):
            w0, w1 = (i * W) // s, ((i + 1) * W + s - 1) // s
            cols.append(jnp.mean(x[:, :, h0:h1, w0:w1], axis=(2, 3)))
        rows.append(jnp.stack(cols, axis=-1))
    return jnp.stack(rows, axis=-2)  # (N, C, s, s)


def _nearest_up_ref(x, H, W):
    _, _, sh, sw = x.shape
    idx_h = (jnp.arange(H) * sh) // H
    idx_w = (jnp.arange(W) * sw) // W
    return x[:, :, idx_h[:, None], idx_w[None, :]]


def psp_forward_ref(x, params, sizes):
    _, _, H, W = x.shape
    out = [_bn_relu_ref(_conv1x1_ref(x, params["rf"]), params["rf"])]
    for s in sizes:
        p = params[f"pool{s}"]
        y = _bn_relu_ref(_conv1x1_ref(_adaptive_avg_pool_ref(x, s), p), p)
        out.append(_nearest_up_ref(y, H, W))
    return jnp.concatenate(out, axis=1)


# ----------------------------------------------------------------------------
if __name__ == "__main__":
    key = jax.random.PRNGKey(0)
    N, C, H, W = 2, 16, 16, 16          # in_feats=16 -> rf=8 ch, 2 ch per branch
    sizes = (1, 3, 5, 7)

    kx, kp = jax.random.split(key)
    x = jax.random.normal(kx, (N, C, H, W), jnp.float32)
    params = init_params(kp, C, sizes)

    out = psp_forward_pallas(x, params, sizes)
    out = jax.block_until_ready(out)

    ref = psp_forward_ref(x, params, sizes)
    assert out.shape == (N, C // 2 + len(sizes) * (C // 8), H, W) == ref.shape
    np.testing.assert_allclose(np.asarray(out), np.asarray(ref), rtol=5e-2, atol=5e-2)

    print("KERNEL_OK")
</pallas_src>

<mosaic_0001>
module attributes {stable_mosaic.version = 11 : i64} {
  func.func @_psp_kernel(%arg0: i32, %arg1: memref<1x16x256xbf16, #tpu.memory_space<vmem>>, %arg2: memref<8x16xbf16, #tpu.memory_space<vmem>>, %arg3: memref<8x1xf32, #tpu.memory_space<vmem>>, %arg4: memref<256x128xbf16, #tpu.memory_space<vmem>>, %arg5: memref<8x16xbf16, #tpu.memory_space<vmem>>, %arg6: memref<8x1xf32, #tpu.memory_space<vmem>>, %arg7: memref<8x128xf32, #tpu.memory_space<vmem>>, %arg8: memref<128x256xbf16, #tpu.memory_space<vmem>>, %arg9: memref<1x16x256xf32, #tpu.memory_space<vmem>>) attributes {dimension_semantics = [#tpu.dimension_semantics<parallel>], iteration_bounds = array<i64: 2>, scalar_prefetch = 0 : i64, scratch_operands = 0 : i64, tpu.core_type = #tpu.core_type<tc>, window_params = [{transform_indices = @transform_0, window_bounds = array<i64: 1, 16, 256>}, {pipeline_mode = #tpu.pipeline_mode<synchronous>, transform_indices = @transform_1, window_bounds = array<i64: 8, 16>}, {pipeline_mode = #tpu.pipeline_mode<synchronous>, transform_indices = @transform_2, window_bounds = array<i64: 8, 1>}, {pipeline_mode = #tpu.pipeline_mode<synchronous>, transform_indices = @transform_3, window_bounds = array<i64: 256, 128>}, {pipeline_mode = #tpu.pipeline_mode<synchronous>, transform_indices = @transform_4, window_bounds = array<i64: 8, 16>}, {pipeline_mode = #tpu.pipeline_mode<synchronous>, transform_indices = @transform_5, window_bounds = array<i64: 8, 1>}, {pipeline_mode = #tpu.pipeline_mode<synchronous>, transform_indices = @transform_6, window_bounds = array<i64: 8, 128>}, {pipeline_mode = #tpu.pipeline_mode<synchronous>, transform_indices = @transform_7, window_bounds = array<i64: 128, 256>}, {transform_indices = @transform_8, window_bounds = array<i64: 1, 16, 256>}]} {
    %c0 = arith.constant 0 : index
    %c0_0 = arith.constant 0 : index
    %c0_1 = arith.constant 0 : index
    %0 = vector.load %arg1[%c0, %c0_0, %c0_1] : memref<1x16x256xbf16, #tpu.memory_space<vmem>>, vector<1x16x256xbf16>
    %1 = vector.shape_cast %0 : vector<1x16x256xbf16> to vector<16x256xbf16>
    %c0_2 = arith.constant 0 : index
    %c0_3 = arith.constant 0 : index
    %2 = vector.load %arg2[%c0_2, %c0_3] : memref<8x16xbf16, #tpu.memory_space<vmem>>, vector<8x16xbf16>
    %cst = arith.constant dense<0.000000e+00> : vector<8x256xf32>
    %3 = tpu.matmul %2, %1, %cst {dimension_numbers = #tpu.dot_dimension_numbers<[1], [0], [0], [1], [0, 0, 1, 1], [], []>} : vector<8x16xbf16>, vector<16x256xbf16>, vector<8x256xf32> -> vector<8x256xf32>
    %c0_4 = arith.constant 0 : index
    %c0_5 = arith.constant 0 : index
    %4 = vector.load %arg3[%c0_4, %c0_5] : memref<8x1xf32, #tpu.memory_space<vmem>>, vector<8x1xf32>
    %5 = vector.broadcast %4 : vector<8x1xf32> to vector<8x256xf32>
    %6 = arith.addf %3, %5 : vector<8x256xf32>
    %cst_6 = arith.constant 0.000000e+00 : f32
    %7 = vector.broadcast %cst_6 : f32 to vector<8x256xf32>
    %8 = arith.maximumf %6, %7 : vector<8x256xf32>
    %c0_7 = arith.constant 0 : index
    %c0_8 = arith.constant 0 : index
    %9 = vector.load %arg4[%c0_7, %c0_8] : memref<256x128xbf16, #tpu.memory_space<vmem>>, vector<256x128xbf16>
    %cst_9 = arith.constant dense<0.000000e+00> : vector<16x128xf32>
    %10 = tpu.matmul %1, %9, %cst_9 {dimension_numbers = #tpu.dot_dimension_numbers<[1], [0], [0], [1], [0, 0, 1, 1], [], []>} : vector<16x256xbf16>, vector<256x128xbf16>, vector<16x128xf32> -> vector<16x128xf32>
    %c0_10 = arith.constant 0 : index
    %c0_11 = arith.constant 0 : index
    %11 = vector.load %arg5[%c0_10, %c0_11] : memref<8x16xbf16, #tpu.memory_space<vmem>>, vector<8x16xbf16>
    %12 = arith.truncf %10 : vector<16x128xf32> to vector<16x128xbf16>
    %cst_12 = arith.constant dense<0.000000e+00> : vector<8x128xf32>
    %13 = tpu.matmul %11, %12, %cst_12 {dimension_numbers = #tpu.dot_dimension_numbers<[1], [0], [0], [1], [0, 0, 1, 1], [], []>} : vector<8x16xbf16>, vector<16x128xbf16>, vector<8x128xf32> -> vector<8x128xf32>
    %c0_13 = arith.constant 0 : index
    %c0_14 = arith.constant 0 : index
    %14 = vector.load %arg6[%c0_13, %c0_14] : memref<8x1xf32, #tpu.memory_space<vmem>>, vector<8x1xf32>
    %15 = vector.broadcast %14 : vector<8x1xf32> to vector<8x128xf32>
    %16 = arith.addf %13, %15 : vector<8x128xf32>
    %cst_15 = arith.constant 0.000000e+00 : f32
    %17 = vector.broadcast %cst_15 : f32 to vector<8x128xf32>
    %18 = arith.maximumf %16, %17 : vector<8x128xf32>
    %c0_16 = arith.constant 0 : index
    %c0_17 = arith.constant 0 : index
    %19 = vector.load %arg7[%c0_16, %c0_17] : memref<8x128xf32, #tpu.memory_space<vmem>>, vector<8x128xf32>
    %20 = arith.mulf %18, %19 : vector<8x128xf32>
    %21 = arith.truncf %20 : vector<8x128xf32> to vector<8x128xbf16>
    %c0_18 = arith.constant 0 : index
    %c0_19 = arith.constant 0 : index
    %22 = vector.load %arg8[%c0_18, %c0_19] : memref<128x256xbf16, #tpu.memory_space<vmem>>, vector<128x256xbf16>
    %cst_20 = arith.constant dense<0.000000e+00> : vector<8x256xf32>
    %23 = tpu.matmul %21, %22, %cst_20 {dimension_numbers = #tpu.dot_dimension_numbers<[1], [0], [0], [1], [0, 0, 1, 1], [], []>} : vector<8x128xbf16>, vector<128x256xbf16>, vector<8x256xf32> -> vector<8x256xf32>
    %24 = tpu.concatenate %8, %23 in 0 : vector<8x256xf32>, vector<8x256xf32> -> vector<16x256xf32>
    %25 = vector.shape_cast %24 : vector<16x256xf32> to vector<1x16x256xf32>
    %c0_21 = arith.constant 0 : index
    %c0_22 = arith.constant 0 : index
    %c0_23 = arith.constant 0 : index
    %26 = vector.load %arg9[%c0_21, %c0_22, %c0_23] : memref<1x16x256xf32, #tpu.memory_space<vmem>>, vector<1x16x256xf32>
    tpu.vector_store %arg9[%c0_21, %c0_22, %c0_23], %25 {strides = array<i32>} : memref<1x16x256xf32, #tpu.memory_space<vmem>>, vector<1x16x256xf32>,
    return
  }
  func.func @transform_0(%arg0: i32) -> (i32, i32, i32) {
    %c0_i32 = arith.constant 0 : i32
    %c0_i32_0 = arith.constant 0 : i32
    %c0_i32_1 = arith.constant 0 : i32
    return %arg0, %c0_i32, %c0_i32_0 : i32, i32, i32
  }
  func.func @transform_1(%arg0: i32) -> (i32, i32) {
    %c0_i32 = arith.constant 0 : i32
    %c0_i32_0 = arith.constant 0 : i32
    %c0_i32_1 = arith.constant 0 : i32
    return %c0_i32, %c0_i32_0 : i32, i32
  }
  func.func @transform_2(%arg0: i32) -> (i32, i32) {
    %c0_i32 = arith.constant 0 : i32
    %c0_i32_0 = arith.constant 0 : i32
    %c0_i32_1 = arith.constant 0 : i32
    return %c0_i32, %c0_i32_0 : i32, i32
  }
  func.func @transform_3(%arg0: i32) -> (i32, i32) {
    %c0_i32 = arith.constant 0 : i32
    %c0_i32_0 = arith.constant 0 : i32
    %c0_i32_1 = arith.constant 0 : i32
    return %c0_i32, %c0_i32_0 : i32, i32
  }
  func.func @transform_4(%arg0: i32) -> (i32, i32) {
    %c0_i32 = arith.constant 0 : i32
    %c0_i32_0 = arith.constant 0 : i32
    %c0_i32_1 = arith.constant 0 : i32
    return %c0_i32, %c0_i32_0 : i32, i32
  }
  func.func @transform_5(%arg0: i32) -> (i32, i32) {
    %c0_i32 = arith.constant 0 : i32
    %c0_i32_0 = arith.constant 0 : i32
    %c0_i32_1 = arith.constant 0 : i32
    return %c0_i32, %c0_i32_0 : i32, i32
  }
  func.func @transform_6(%arg0: i32) -> (i32, i32) {
    %c0_i32 = arith.constant 0 : i32
    %c0_i32_0 = arith.constant 0 : i32
    %c0_i32_1 = arith.constant 0 : i32
    return %c0_i32, %c0_i32_0 : i32, i32
  }
  func.func @transform_7(%arg0: i32) -> (i32, i32) {
    %c0_i32 = arith.constant 0 : i32
    %c0_i32_0 = arith.constant 0 : i32
    %c0_i32_1 = arith.constant 0 : i32
    return %c0_i32, %c0_i32_0 : i32, i32
  }
  func.func @transform_8(%arg0: i32) -> (i32, i32, i32) {
    %c0_i32 = arith.constant 0 : i32
    %c0_i32_0 = arith.constant 0 : i32
    %c0_i32_1 = arith.constant 0 : i32
    return %arg0, %c0_i32, %c0_i32_0 : i32, i32, i32
  }
}

</mosaic_0001>

<bundles_post_ra>
// kernel: tpu_custom_call.1
= control target key start
LH: loop header
LB: loop body
LE: loop exit
PB: predicated region body
PF: predicated region fallthrough
CT: control target
= control target key end

     0   :  { %s1527_s0 = inlined_call_operand.hbm [shape: bf16[2,16,256], index: 0, kind: input, shape index: {}]   ;;  %s1528_s1 = inlined_call_operand.vmem [shape: bf16[8,16], index: 1, kind: input, shape index: {}]   ;;  %s1529_s2 = inlined_call_operand.vmem [shape: f32[8,1], index: 2, kind: input, shape index: {}]   ;;  %s1530_s3 = inlined_call_operand.hbm [shape: bf16[256,128], index: 3, kind: input, shape index: {}]   ;;  %s1531_s4 = inlined_call_operand.vmem [shape: bf16[8,16], index: 4, kind: input, shape index: {}]   ;;  %s1532_s5 = inlined_call_operand.vmem [shape: f32[8,1], index: 5, kind: input, shape index: {}]   ;;  %s1533_s6 = inlined_call_operand.vmem [shape: f32[8,128], index: 6, kind: input, shape index: {}]   ;;  %s1534_s7 = inlined_call_operand.hbm [shape: bf16[128,256], index: 7, kind: input, shape index: {}]   ;;  %s1535_s8 = inlined_call_operand.hbm [shape: f32[2,16,256], index: 8, kind: output, shape index: {}]  }
   0x1   :  { %1542 = sst [smem:[#allocation12_spill]] %s1530_s3 }
   0x2   :  { %1543 = sst [smem:[#allocation13_spill]] %s1534_s7 }
   0x3   :  { %13 = vsyncpa [#allocation3], 0 }
   0x4   :  { %15 = vsyncpa [#allocation3 + $0x1], 0 }
   0x5   :  { %16 = vsyncpa [#allocation6], 0 }
   0x6   :  { %17 = vsyncpa [#allocation4], 0 }
   0x7   :  { %19 = vsyncpa [#allocation4 + $0x1], 0  ;;  %s1305_s27 = smov 0   ;;  %s1307_s28 = smov 0  }
   0x8   :  { %s1309_s29 = smov 0   ;;  %s1311_s30 = smov 0  }
   0x9 LB: > { %s1326_s9 = sadd.s32 4294967295, %s1245_s30   ;;  %s891_s10 = sadd.s32 4294967294, %s1245_s30   ;;  %s1245_s30 = sphi %s1311_s30, %s1565_s30   ;;  %s1241_s29 = sphi %s1309_s29, %s1564_s29   ;;  %s1237_s28 = sphi %s1307_s28, %s1563_s28   ;;  %s1233_s27 = sphi %s1305_s27, %s1562_s27  }
   0xa   : > { %p45_p0 = scmp.ne.s32.totalorder %s1237_s28, %s1233_s27  ;;  %p1536_p1 = scmp.eq.s32.totalorder %s1326_s9, 0 }
   0xb   : > { %p222_p3 = scmp.eq.s32.totalorder %s891_s10, 1  ;;  %p892_p5 = scmp.ge.s32.totalorder %s1245_s30, 1 }
   0xc   : > { %p1335_p4 = por %p1536_p1, %p45_p0  ;;  %p229_p7 = scmp.lt.s32.totalorder %s1245_s30, 3 }
   0xd   : > { %p1340_p6 = por %p222_p3, %p45_p0  ;;  %s1247_s14 = smov [#allocation5]  }
   0xe   : > { %s1544_s11 = scalar_select %p1335_p4, 1, 0 }
   0xf   : > { %s1545_s12 = scalar_select %p1340_p6, 1, 0 }
  0x10   : > { %p1345_p8 = pnand %p892_p5, %p229_p7  ;;  %s247_s15 = sshll.u32 %s1247_s14, 4  ;;  %s248_s15 = int_to_ptr.vmem [resolvable:$true] %s247_s15 }
  0x11   : > { %s1248_s17 = smov [#allocation7]   ;;  %s1108_s19 = scalar_lea.vmem %s248_s15, 2048 }
  0x12   : > { %s1546_s13 = scalar_select %p1345_p8, 1, 0 }
  0x13   : > { %p989_p9 = pneg %p1345_p8  ;;  %s269_s18 = sshll.u32 %s1248_s17, 4  ;;  %s270_s18 = int_to_ptr.vmem [resolvable:$true] %s269_s18 }
  0x14   : > { %p1109_p13 = scmp.ne.s32.totalorder %s248_s15, %s1108_s19  ;;  %p1116_p5 = scmp.lt.s32.totalorder %s248_s15, %s248_s15 }
  0x15   : > { %p1354_p11 = pnand %p989_p9, %p1536_p1  ;;  %p1117_p7 = scmp.lt.s32.totalorder %s1108_s19, %s1108_s19 }
  0x17   : > { %p1099_p12 = pneg %p1354_p11  ;;  %p1118_p10 = por %p1117_p7, %p1116_p5 }
  0x19   : > { %p1111_p0 = pnand %p1109_p13, %p1099_p12 }
  0x1b   : > { %p1112_p3 = pneg %p1111_p0 }
  0x1d   : > { %p1119_p9 = pnand %p1118_p10, %p1112_p3 }
  0x1f   : > { %1122 = shalt.err (!%p1119_p9)
}
  0x20   : > { %s1249_s20 = smov 64   ;;  %s1250_s21 = smov 4  }
  0x21   : > { %s1548_s3 = sld [smem:[#allocation12_spill]]  ;;  %s1134_s24 = scalar_lea.vmem %s270_s18, 2048 }
  0x22   : > { %p1135_p1 = scmp.ne.s32.totalorder %s270_s18, %s1134_s24  ;;  %p1142_p2 = scmp.lt.s32.totalorder %s270_s18, %s270_s18 }
  0x23   : > { %p1143_p6 = scmp.lt.s32.totalorder %s1134_s24, %s1134_s24 }
  0x24   : > { %p1137_p13 = pnand %p1135_p1, %p1099_p12 }
  0x25   : > { %p1144_p5 = por %p1143_p6, %p1142_p2 }
  0x26   : > { %p1138_p0 = pneg %p1137_p13 }
  0x27   : > { %992 = dma.hbm_to_vmem [thread:$0]  (!%p1354_p11), %s1548_s3, 2048, %s248_s15, [#allocation6], %s1249_s20, %s1249_s20, %s1250_s21  }
  0x28   : > { %p1145_p10 = pnand %p1144_p5, %p1138_p0 }
  0x2a   : > { %1148 = shalt.err (!%p1145_p10)
}
  0x2b   : > { %s1537_s25 = smov 128   ;;  %s1538_s26 = smov 8  }
  0x2c   : > { %s1549_s7 = sld [smem:[#allocation13_spill]]  ;;  %s1380_s15 = sadd.s32 1, %s1245_s30  }
  0x2d   : > { %s29_s17 = ssub.s32 %s1245_s30, %s1380_s15  ;;  %s32_s19 = sadd.s32 1, %s1241_s29 }
  0x2e   : > { %p30_p1 = scmp.eq.s32.totalorder %s29_s17, 0  ;;  %p39_p2 = scmp.ne.s32.totalorder %s1241_s29, %s1237_s28 }
  0x2f   : > { %p40_p6 = scmp.eq.s32.totalorder %s1245_s30, 0  ;;  %p1550_p3 = scmp.eq.s32.totalorder %s1326_s9, 1 }
  0x30   : > { %s1389_s20 = scalar_select %p30_p1, %s1241_s29, %s32_s19  }
  0x31   : > { %p41_p12 = por %p40_p6, %p39_p2  ;;  %p1393_p7 = por %p1550_p3, %p39_p2 }
  0x32   : > { %995 = dma.hbm_to_vmem [thread:$0]  (!%p1354_p11), %s1549_s7, 2048, %s270_s18, [#allocation6], %s1537_s25, %s1537_s25, %s1538_s26  }
  0x33   : > { %s1551_s16 = scalar_select %p1393_p7, 1, 0 }
  0x34   : > { %p1006_p9 = scmp.lt.s32.totalorder %s1245_s30, 2  ;;  %s283_s21 = sand.u32 1, %s1241_s29  }
  0x35   : > { %s896_s22 = sshll.u32 %s283_s21, 4  ;;  %s945_s18 = sshll.u32 %s1245_s30, 8 }
  0x36   : > { %s1403_s10 = scalar_lea.hbm %s1527_s0, %s945_s18  ;;  %s287_s14 = scalar_lea.vmem [#allocation2], %s896_s22 }
  0x37   : > { %s294_s17 = sshll.u32 %s287_s14, 4  ;;  %p1407_p11 = pnand %p1006_p9, %p41_p12  ;;  %s1405_s17 = int_to_ptr.vmem [resolvable:$true] %s294_s17 }
  0x38   : > { %s1411_s25 = scalar_lea.sflag [#allocation3], %s283_s21  ;;  %s1149_s26 = scalar_lea.hbm %s1403_s10, 256 }
  0x39   : > { %p1150_p13 = scmp.ne.s32.totalorder %s1403_s10, %s1149_s26  ;;  %p1151_p0 = pneg %p1407_p11 }
  0x3a   : > { %s1154_s22 = scalar_lea.hbm %s1527_s0, 512  ;;  %p1155_p1 = scmp.lt.s32.totalorder %s1403_s10, %s1527_s0 }
  0x3b   : > { %p1152_p5 = pnand %p1151_p0, %p1150_p13  ;;  %p1156_p2 = scmp.lt.s32.totalorder %s1154_s22, %s1149_s26 }
  0x3d   : > { %p1153_p10 = pneg %p1152_p5  ;;  %p1157_p6 = por %p1156_p2, %p1155_p1 }
  0x3f   : > { %p1158_p12 = pnand %p1157_p6, %p1153_p10 }
  0x41   : > { %1161 = shalt.err (!%p1158_p12)
}
  0x42   : > { %s1162_s21 = scalar_lea.vmem %s1405_s17, 256  ;;  %s1253_s3 = smov [#allocation2]  }
  0x43   : > { %p1163_p3 = scmp.ne.s32.totalorder %s1405_s17, %s1162_s21  ;;  %s1167_s7 = sshll.u32 %s1253_s3, 4  ;;  %s1168_s7 = int_to_ptr.vmem [resolvable:$false] %s1167_s7 }
  0x44   : > { %s1169_s18 = scalar_lea.vmem %s1168_s7, 512  ;;  %p1170_p5 = scmp.lt.s32.totalorder %s1405_s17, %s1168_s7 }
  0x45   : > { %p1165_p9 = pnand %p1163_p3, %p1151_p0  ;;  %p1171_p7 = scmp.lt.s32.totalorder %s1169_s18, %s1162_s21 }
  0x47   : > { %p1166_p13 = pneg %p1165_p9  ;;  %p1172_p4 = por %p1171_p7, %p1170_p5 }
  0x49   : > { %p1173_p8 = pnand %p1172_p4, %p1166_p13 }
  0x4b   : > { %1176 = shalt.err (!%p1173_p8)
}
  0x4c   : > { %s1553_s26 = smov 8   ;;  %s1554_s23 = smov 128  }
  0x4d   : > { %999 = dma.hbm_to_vmem [thread:$0]  (!%p1407_p11), %s1403_s10, 256, %s1405_s17, %s1411_s25, %s1554_s23, %s1554_s23, %s1553_s26  }
  0x4e   : > { %p1555_p0 = scmp.ne.s32.totalorder %s1546_s13, 0 }
  0x4f   : > { %s1438_s3 = sand.u32 (!%p1555_p0), 1, %s1237_s28   ;;  %p1556_p4 = scmp.ne.s32.totalorder (!%p1555_p0), %s1544_s11, 0 }
  0x50   : > { %306 = sbr.rel (%p1555_p0) target bundleno = 744 (0x2e8), region = 52  ;;  %s900_s7 = sshll.u32 (!%p1555_p0), %s1438_s3, 4 }
  0x51   : > { %s309_s22 = scalar_lea.sflag (!%p1555_p0), [#allocation3], %s1438_s3  ;;  %s312_s24 = scalar_lea.vmem (!%p1555_p0), [#allocation2], %s900_s7 }
  0x55   : > { %1220 = dma.done.wait (%p1556_p4), %s309_s22, 256  }
  0x56   : > { %1222 = vsyncadd (%p1556_p4), %s309_s22, 4294967040  ;;  %p1557_p8 = scmp.eq.s32.totalorder %s1326_s9, 0 }
  0x58   : > { %1224 = dma.done.wait (%p1557_p8), [#allocation6], 4096   ;;  %p1558_p7 = pmov %p1557_p8 }
  0x59   : > { %v1254_v0 = vmov 0   ;;  %v1054_v1 = vld [vmem:[%s312_s24 + $0x4] ss:$8 sps:$4 sm:$0xff]   ;;  %v1056_v2 = vld [vmem:[%s312_s24] ss:$8 sps:$4 sm:$0xff]   ;;  %vm373_vm0 = vcmask 130048  }
  0x5a   : > { %1226 = vsyncadd (%p1558_p7), [#allocation6], 4294963200  ;;  %409 = vmatprep.mubr.bf16.mxu1 %v1254_v0  ;;  %1053 = vset.pattern.permute.xlu0 %v1254_v0  ;;  %v356_v3 = vld [vmem:[%s1528_s1] sm:$0xf]  ;;  %v1057_v4 = vld [vmem:[#allocation5 + $0x78] sm:$0xff]   ;;  %v1255_v22 = vmov 0.0  }
  0x5b   : > { %391 = vmatprep.subr.bf16.mxu1 %v1054_v1  ;;  %v1058_v5 = vld [vmem:[#allocation5 + $0x38] sm:$0xff]   ;;  %v1059_v6 = vld [vmem:[#allocation5 + $0x70] sm:$0xff]   ;;  %v1061_v8 = vld [vmem:[#allocation5 + $0x68] sm:$0xff]   ;;  %971 = vmatprep.subr.bf16.mxu0 %v1255_v22  ;;  %vm1256_vm1 = vmmov 0   ;;  %s903_s14 = sshll.u32 %s1438_s3, 5  ;;  %s946_s24 = sshll.u32 %s1326_s9, 9 }
  0x5c   : > { %392 = vmatpush1.bf16.msra.mxu1 %v1056_v2  ;;  %v1060_v7 = vld [vmem:[#allocation5 + $0x30] sm:$0xff]   ;;  %v1062_v9 = vld [vmem:[#allocation5 + $0x28] sm:$0xff]   ;;  %v1063_v10 = vld [vmem:[#allocation5 + $0x60] sm:$0xff]   ;;  %973 = vmatprep.mubr.msk.bf16.mxu0 %vm1256_vm1, %v1255_v22  ;;  %s1463_s21 = scalar_lea.vmem [#allocation8], %s903_s14  ;;  %s1482_s11 = scalar_lea.hbm %s1535_s8, %s946_s24 }
  0x5d   : > { %947 = vmatprep.subr.bf16.mxu1 %v1057_v4  ;;  %v1064_v11 = vld [vmem:[#allocation5 + $0x20] sm:$0xff]   ;;  %v1065_v12 = vld [vmem:[#allocation5 + $0x58] sm:$0xff]   ;;  %v1067_v15 = vld [vmem:[#allocation5 + $0x50] sm:$0xff]   ;;  %s799_s22 = sshll.u32 %s1463_s21, 4  ;;  %s786_s10 = scalar_lea.sflag [#allocation4], %s1438_s3  ;;  %s1477_s22 = int_to_ptr.vmem [resolvable:$true] %s799_s22 }
  0x5e   : > { %v1066_v13 = vld [vmem:[#allocation5 + $0x18] sm:$0xff]   ;;  %v591_v14 = vld [vmem:[%s1532_s5] sm:$0xff]  ;;  %v1068_v17 = vld [vmem:[#allocation5 + $0x10] sm:$0xff]   ;;  %s1177_s17 = scalar_lea.vmem %s1477_s22, 512  ;;  %p1559_p10 = scmp.ne.s32.totalorder %s1551_s16, 0 }
  0x5f   : > { %906 = vmatmul.mubr.msk.bf16.vlgmr.msra.gmra.mxu1 %vm373_vm0, %v356_v3  ;;  %594 = vperm.xlu0 %1053, %v591_v14   ;;  %v357_v16 = vld [vmem:[%s1529_s2] sm:$0xff]  ;;  %v1069_v18 = vld [vmem:[#allocation5 + $0x48] sm:$0xff]   ;;  %v1075_v39 = vld [vmem:[#allocation7 + $0x74] ss:$8 sps:$4 sm:$0xff]   ;;  %p1178_p11 = scmp.ne.s32.totalorder %s1477_s22, %s1177_s17  ;;  %s1257_s9 = smov [#allocation8]  }
  0x60   : > { %948 = vmatpush3.bf16.msra.mxu1 %v1058_v5  ;;  %580 = vmatprep.mubr.bf16.mxu1 %v1054_v1  ;;  %v1070_v19 = vld [vmem:[#allocation5 + $0x8] sm:$0xff]   ;;  %v1071_v20 = vld [vmem:[#allocation5 + $0x40] sm:$0xff]   ;;  %v1073_v42 = vld [vmem:[#allocation7 + $0x70] ss:$8 sps:$4 sm:$0xff]   ;;  %s1181_s19 = sshll.u32 %s1257_s9, 4  ;;  %s1182_s19 = int_to_ptr.vmem [resolvable:$false] %s1181_s19 }
  0x61   : > { %949 = vmatprep.subr.bf16.mxu1 %v1059_v6  ;;  %v1072_v21 = vld [vmem:[#allocation5] sm:$0xff]   ;;  %v1081_v45 = vld [vmem:[#allocation7 + $0x54] ss:$8 sps:$4 sm:$0xff]   ;;  %v1079_v46 = vld [vmem:[#allocation7 + $0x50] ss:$8 sps:$4 sm:$0xff]   ;;  %p1179_p1 = pnand %p1178_p11, %p1559_p10  ;;  %s1183_s14 = scalar_lea.vmem %s1182_s19, 1024 }
  0x62   : > { %v589_v41 = vld [vmem:[%s1531_s4] sm:$0xf]  ;;  %v1078_v43 = vld [vmem:[#allocation7 + $0x64] ss:$8 sps:$4 sm:$0xff]   ;;  %v1087_v49 = vld [vmem:[#allocation7 + $0x34] ss:$8 sps:$4 sm:$0xff]   ;;  %p1184_p6 = scmp.lt.s32.totalorder %s1477_s22, %s1182_s19  ;;  %p1185_p12 = scmp.lt.s32.totalorder %s1183_s14, %s1177_s17 }
  0x63   : > { %360 = vperm.xlu0 %1053, %v357_v16   ;;  %v1076_v44 = vld [vmem:[#allocation7 + $0x60] ss:$8 sps:$4 sm:$0xff]   ;;  %v1084_v47 = vld [vmem:[#allocation7 + $0x44] ss:$8 sps:$4 sm:$0xff]   ;;  %v1085_v50 = vld [vmem:[#allocation7 + $0x30] ss:$8 sps:$4 sm:$0xff]   ;;  %p1180_p2 = pneg %p1179_p1 }
  0x64   : > { %950 = vmatpush3.bf16.msra.mxu1 %v1060_v7  ;;  %v1082_v48 = vld [vmem:[#allocation7 + $0x40] ss:$8 sps:$4 sm:$0xff]   ;;  %v1090_v51 = vld [vmem:[#allocation7 + $0x24] ss:$8 sps:$4 sm:$0xff]   ;;  %v1093_v53 = vld [vmem:[#allocation7 + $0x14] ss:$8 sps:$4 sm:$0xff]   ;;  %p1186_p3 = por %p1185_p12, %p1184_p6 }
  0x65   : > { %951 = vmatprep.subr.bf16.mxu1 %v1061_v8  ;;  %v1088_v52 = vld [vmem:[#allocation7 + $0x20] ss:$8 sps:$4 sm:$0xff]   ;;  %v1091_v54 = vld [vmem:[#allocation7 + $0x10] ss:$8 sps:$4 sm:$0xff]   ;;  %v1096_v55 = vld [vmem:[#allocation7 + $0x4] ss:$8 sps:$4 sm:$0xff]  }
  0x66   : > { %v1094_v56 = vld [vmem:[#allocation7] ss:$8 sps:$4 sm:$0xff]   ;;  %p1187_p9 = pnand %p1186_p3, %p1180_p2 }
  0x67   : > { %v641_v59 = vld [vmem:[%s1533_s6] sm:$0xff] }
  0x68   : > { %952 = vmatpush3.bf16.msra.mxu1 %v1062_v9 }
  0x69   : > { %953 = vmatprep.subr.bf16.mxu1 %v1063_v10 }
  0x6c   : > { %954 = vmatpush3.bf16.msra.mxu1 %v1064_v11 }
  0x6d   : > { %955 = vmatprep.subr.bf16.mxu1 %v1065_v12 }
  0x70   : > { %956 = vmatpush3.bf16.msra.mxu1 %v1066_v13 }
  0x71   : > { %957 = vmatprep.subr.bf16.mxu1 %v1067_v15 }
  0x74   : > { %958 = vmatpush3.bf16.msra.mxu1 %v1068_v17 }
  0x75   : > { %959 = vmatprep.subr.bf16.mxu1 %v1069_v18 }
  0x78   : > { %960 = vmatpush3.bf16.msra.mxu1 %v1070_v19 }
  0x79   : > { %961 = vmatprep.subr.bf16.mxu1 %v1071_v20 }
  0x7c   : > { %962 = vmatpush3.bf16.msra.mxu1 %v1072_v21 }
  0x7f   : > { %581 = vmatmul.mubr.bf16.vlgmr.msra.gmra.mxu1 %v1056_v2 }
  0xda   : > { %v595_v23 = vpop.permute.xlu0 %594 }
  0xde   : > { %v361_v24 = vpop.permute.xlu0 %360 }
 0x11f   : > { %v411_v25 = vpop.f32.mrf.mxu1 }
 0x120   : > { %v412_v26 = vadd.f32 %v411_v25, %v361_v24 }
 0x121   : > { %v413_v27 = vpop.f32.mrf.mxu1 }
 0x122   : > { %v418_v28 = vmax.f32 %v412_v26, 0.0  ;;  %v414_v29 = vadd.f32 %v413_v27, %v361_v24 }
 0x123   : > { %v415_v30 = vpop.f32.mrf.mxu1 }
 0x124   : > { %781 = vst [vmem:[%s1463_s21] sm:$0xff] %v418_v28  ;;  %v419_v31 = vmax.f32 %v414_v29, 0.0 }
 0x125   : > { %v416_v32 = vpop.f32.mrf.mxu1 }
 0x126   : > { %782 = vst [vmem:[%s1463_s21 + $0x8] sm:$0xff] %v419_v31 }
 0x13f   : > { %v963_v33 = vpop.f32.mrf.mxu1 }
 0x141   : > { %v964_v34 = vpop.f32.mrf.mxu1 }
 0x142   : > { %v965_v37 = vadd.f32 %v964_v34, %v963_v33 }
 0x143   : > { %v966_v35 = vpop.f32.mrf.mxu1 }
 0x145   : > { %v967_v36 = vpop.f32.mrf.mxu1 }
 0x146   : > { %v968_v38 = vadd.f32 %v967_v36, %v966_v35 }
 0x148   : > { %v590_v40 = vpack.c.bf16 %v968_v38, %v965_v37 }
 0x14a   : > { %972 = vmatpush3.bf16.msra.mxu0 %v590_v40 }
 0x14b   : > { %740 = vmatprep.subr.bf16.mxu0 %v1075_v39 }
 0x14d   : > { %974 = vmatmul.mubr.msk.bf16.vlgmr.msra.gmra.mxu0 %vm373_vm0, %v589_v41 }
 0x14e   : > { %741 = vmatpush1.bf16.msra.mxu0 %v1073_v42  ;;  %772 = vmatprep.mubr.bf16.mxu0 %v1254_v0 }
 0x14f   : > { %742 = vmatprep.subr.bf16.mxu0 %v1078_v43 }
 0x152   : > { %743 = vmatpush1.bf16.msra.mxu0 %v1076_v44 }
 0x153   : > { %744 = vmatprep.subr.bf16.mxu0 %v1081_v45 }
 0x156   : > { %745 = vmatpush1.bf16.msra.mxu0 %v1079_v46 }
 0x157   : > { %746 = vmatprep.subr.bf16.mxu0 %v1084_v47 }
 0x15a   : > { %747 = vmatpush1.bf16.msra.mxu0 %v1082_v48 }
 0x15b   : > { %748 = vmatprep.subr.bf16.mxu0 %v1087_v49 }
 0x15e   : > { %749 = vmatpush1.bf16.msra.mxu0 %v1085_v50 }
 0x15f   : > { %750 = vmatprep.subr.bf16.mxu0 %v1090_v51 }
 0x162   : > { %751 = vmatpush1.bf16.msra.mxu0 %v1088_v52 }
 0x163   : > { %752 = vmatprep.subr.bf16.mxu0 %v1093_v53 }
 0x166   : > { %753 = vmatpush1.bf16.msra.mxu0 %v1091_v54 }
 0x167   : > { %754 = vmatprep.subr.bf16.mxu0 %v1096_v55 }
 0x16a   : > { %755 = vmatpush1.bf16.msra.mxu0 %v1094_v56 }
 0x20d   : > { %v634_v57 = vpop.f32.mrf.mxu0 }
 0x20e   : > { %v635_v58 = vadd.f32 %v634_v57, %v595_v23 }
 0x20f   : > { %v975_v60 = vpop.f32.mrf.mxu0 }
 0x210   : > { %v640_v61 = vmax.f32 %v635_v58, 0.0 }
 0x211   : > { %v637_v62 = vpop.f32.mrf.mxu0 }
 0x212   : > { %v642_v63 = vmul.f32 %v641_v59, %v640_v61 }
 0x213   : > { %v976_v0 = vpop.f32.mrf.mxu0 }
 0x214   : > { %v643_v1 = vpack.c.bf16 %v642_v63, %v642_v63 }
 0x216   : > { %773 = vmatmul.mubr.bf16.vlgmr.msra.gmra.mxu0 %v643_v1 }
 0x2d6   : > { %v774_v2 = vpop.f32.mrf.mxu0 }
 0x2d7   : > { %783 = vst [vmem:[%s1463_s21 + $0x10] sm:$0xff] %v774_v2 }
 0x2d8   : > { %v776_v3 = vpop.f32.mrf.mxu0 }
 0x2d9   : > { %784 = vst [vmem:[%s1463_s21 + $0x18] sm:$0xff] %v776_v3 }
 0x2da   : > { %v778_v4 = vpop.f32.mrf.mxu0 }
 0x2db   : > { %1190 = shalt.err (!%p1187_p9)
}
 0x2dc   : > { %s1191_s21 = scalar_lea.hbm %s1482_s11, 512  ;;  %s1195_s23 = scalar_lea.hbm %s1535_s8, 1024 }
 0x2dd   : > { %p1192_p13 = scmp.ne.s32.totalorder %s1482_s11, %s1191_s21  ;;  %p1196_p4 = scmp.lt.s32.totalorder %s1482_s11, %s1535_s8 }
 0x2de   : > { %p1197_p8 = scmp.lt.s32.totalorder %s1195_s23, %s1191_s21 }
 0x2df   : > { %p1193_p5 = pnand %p1192_p13, %p1559_p10 }
 0x2e0   : > { %p1198_p7 = por %p1197_p8, %p1196_p4 }
 0x2e1   : > { %p1194_p0 = pneg %p1193_p5 }
 0x2e3   : > { %p1199_p11 = pnand %p1198_p7, %p1194_p0 }
 0x2e5   : > { %1202 = shalt.err (!%p1199_p11)
}
 0x2e6   : > { %s1258_s13 = smov 256   ;;  %s1259_s25 = smov 16   ;;  %v779_v5 = vpop.f32.mrf.mxu0 }
 0x2e7   : > { %987 = dma.vmem_to_hbm [thread:$0]  (%p1559_p10), %s1477_s22, 512, %s1482_s11, %s786_s10, %s1258_s13, %s1258_s13, %s1259_s25  }
 0x2e8 PF: > { %s814_s17 = sand.u32 1, %s1233_s27   ;;  %p1560_p1 = scmp.ne.s32.totalorder %s1545_s12, 0 }
 0x2e9   : > { %p1561_p2 = scmp.ge.s32.totalorder %s1245_s30, 2  ;;  %s815_s9 = scalar_lea.sflag [#allocation4], %s814_s17 }
 0x2eb   : > { %p1001_p6 = pnand %p1561_p2, %p1560_p1 }
 0x2ed   : > { %p1002_p12 = pneg %p1001_p6 }
 0x2ef   : > { %1228 = dma.done.wait (%p1002_p12), %s815_s9, 512  }
 0x2f0   : > { %1230 = vsyncadd (%p1002_p12), %s815_s9, 4294966784  ;;  %p22_p3 = scmp.ge.s32.totalorder %s1380_s15, 4   ;;  %s1562_s27 = smov %s1237_s28 }
 0x2f1   : > { %s1563_s28 = smov %s1241_s29  ;;  %s1564_s29 = smov %s1389_s20 }
 0x2f2   : > { %s1565_s30 = smov %s1380_s15  ;;  %24 = sbr.rel (!%p22_p3) target bundleno = 9 (0x9), region = 105 }
 0x2f7   :  { %820 = vsyncpa [#allocation3], 1 }
 0x2f8   :  { %822 = vsyncpa [#allocation3 + $0x1], 1 }
 0x2f9   :  { %823 = vsyncpa [#allocation6], 1 }
 0x2fa   :  { %824 = vsyncpa [#allocation4], 1 }
 0x2fb   :  { %826 = vsyncpa [#allocation4 + $0x1], 1 }

</bundles_post_ra>
